<compile_context>
chip_gen: v6e
topology: v6e:2x2x1
jax: 0.10.0
libtpu: 0.0.40
codegen_flags: <defaults>
</compile_context>

<pallas_src>
import functools

import jax
import jax.numpy as jnp
from jax.experimental import pallas as pl
from jax.experimental.pallas import tpu as pltpu

# ---- stand-in for `args` ---------------------------------------------------
SPLIT_FACTOR = 2          # args.split_factor
LOOP_FACTOR = 2           # args.loop_factor
NUM_CLASSES = 16          # args.num_classes
COT_WEIGHT = 0.5          # args.cot_weight


# ---- fused kernel: per-split forward + ensemble + CE + JS co-training loss --
def _splitnet_kernel(x_ref, w_ref, b_ref, tgt_ref,            # inputs
                     logits_ref, ens_ref, loss_ref,           # outputs
                     *, n_splits, k_split, num_classes, batch_total, cot_weight):
    """One batch tile; all splits unrolled, accumulation in registers."""
    tgt = tgt_ref[...]                                          # [TB, 1] int32
    tb = tgt.shape[0]
    cls = jax.lax.broadcasted_iota(jnp.int32, (tb, num_classes), 1)

    ens = jnp.zeros((tb, num_classes), jnp.float32)
    p_sum = jnp.zeros((tb, num_classes), jnp.float32)
    ce = jnp.float32(0.0)
    h_sep = jnp.float32(0.0)

    for l in range(n_splits):                                   # L is small: unrolled
        # torch.chunk(x, L, dim=1) == contiguous lane slice of the flat block.
        xs = x_ref[:, l * k_split:(l + 1) * k_split].astype(jnp.float32)   # [TB, Cp*HW]
        # GAP folded into the matmul: w_ref[l] holds w/HW replicated over HW.
        logits = jnp.dot(xs, w_ref[l],
                         preferred_element_type=jnp.float32)    # [TB, NC]
        logits = logits + b_ref[l]
        logits_ref[l] = logits                                  # unpadded per-split logits

        # numerically-stable softmax / log-softmax over the class axis
        m = jnp.max(logits, axis=-1, keepdims=True)
        z = logits - m
        e = jnp.exp(z)
        s = jnp.sum(e, axis=-1, keepdims=True)
        p = e / s                                               # (exact divide keeps 1e-5-level accuracy)
        logp = z - jnp.log(s)

        ens = ens + logits                                      # ensemble = mean of raw logits
        p_sum = p_sum + p                                       # for H(mean_i p_i)
        # CE via target-index select (no one-hot input): -logp[b, target[b]]
        ce = ce + jnp.sum(jnp.where(cls == tgt, -logp, 0.0))
        h_sep = h_sep + jnp.sum(-p * logp)

    ens_ref[...] = ens * (1.0 / n_splits)

    p_mean = p_sum * (1.0 / n_splits)                           # softmax probs -> strictly > 0
    h_mean = jnp.sum(-p_mean * jnp.log(p_mean))
    ce_val = ce * (1.0 / batch_total)                           # sum over splits of batch-mean CE
    cot_val = cot_weight * (h_mean - h_sep * (1.0 / n_splits)) * (1.0 / batch_total)
    row = jax.lax.broadcasted_iota(jnp.int32, loss_ref.shape, 1)
    loss_ref[...] = jnp.where(row == 0, ce_val,
                              jnp.where(row == 1, cot_val, 0.0))


# ---- VMEM budgeting / tiling -------------------------------------------------
def _round_up(x, m):
    return ((x + m - 1) // m) * m


def _vmem_limit_bytes():
    """Per-generation scoped-VMEM limit: ~96 MiB on v5e/v6e (128 MiB physical),
    48 MiB on v7x (64 MiB per TensorCore)."""
    cap = 64 << 20                                   # conservative fallback (v7x)
    try:
        cap = int(pltpu.get_tpu_info().vmem_capacity_bytes)
    except Exception:
        pass
    return int(min(cap * 3 // 4, 96 << 20))


def _choose_batch_tile(batch, per_row_bytes, tile_budget):
    """Largest batch tile (multiple of 8, dividing batch) whose double-buffered
    per-tile blocks fit `tile_budget`; keeps >= 2 tiles when the batch allows so
    the 'parallel' batch axis can shard across v7x's two TensorCores."""
    cands = [d for d in range(8, batch + 1, 8) if batch % d == 0]
    if not cands:
        # TODO(synk): ragged batches (< 8 rows or no multiple-of-8 divisor) fall
        # back to a single full-batch tile; no padding/masking path implemented.
        return batch
    if batch >= 16:
        two_plus = [d for d in cands if batch // d >= 2]
        if two_plus:
            cands = two_plus
    fitting = [d for d in cands if 2 * d * per_row_bytes <= tile_budget]
    return max(fitting) if fitting else min(cands)


# ---- wrapper ----------------------------------------------------------------
@jax.jit
def splitnet_forward(x, target, weights, biases):
    """Returns (ensemble_output, outputs, ce_loss, cot_loss) like SplitNet.forward('train')."""
    B, C, H, W = x.shape
    L, Cp, NC = weights.shape
    HW = H * W
    K = Cp * HW

    # is_diff_data_train: torch.chunk(x, L, dim=1) == pure reshape, no HBM copy.
    x_flat = x.reshape(B, L * K)

    # Fold GAP into the classifier: w_exp[l, c*HW + hw, n] = w[l, c, n] / HW.
    w_exp = jnp.repeat(weights.astype(jnp.float32) * (1.0 / HW), HW, axis=1)   # [L, K, NC]
    b_f32 = biases.astype(jnp.float32).reshape(L, 1, NC)
    tgt2d = target.astype(jnp.int32).reshape(B, 1)

    itemsize = jnp.dtype(x.dtype).itemsize
    ncl = _round_up(NC, 128)
    vmem_limit = _vmem_limit_bytes()
    # TB-independent, double-buffered blocks (resident params + loss partials)
    fixed = 2 * (L * _round_up(K, 8) * ncl * 4        # w_exp
                 + L * 8 * ncl * 4                    # bias
                 + 8 * 128 * 4)                       # loss block
    # per-batch-row, double-buffered blocks (lane-padded)
    per_row = (_round_up(L * K, 128) * itemsize       # x
               + L * ncl * 4                          # per-split logits out
               + ncl * 4                              # ensemble out
               + 128 * 4)                             # target
    TB = _choose_batch_tile(B, per_row, vmem_limit - fixed - (2 << 20))
    NB = B // TB

    kernel = functools.partial(
        _splitnet_kernel, n_splits=L, k_split=K, num_classes=NC,
        batch_total=float(B), cot_weight=COT_WEIGHT)

    grid_spec = pltpu.PrefetchScalarGridSpec(
        num_scalar_prefetch=0,
        grid=(NB,),                                   # batch tiles only; splits unrolled in-kernel
        in_specs=[
            pl.BlockSpec((TB, L * K), lambda b: (b, 0)),
            pl.BlockSpec((L, K, NC), lambda b: (0, 0, 0)),   # resident: block idx never changes
            pl.BlockSpec((L, 1, NC), lambda b: (0, 0, 0)),   # resident
            pl.BlockSpec((TB, 1), lambda b: (b, 0)),
        ],
        out_specs=(
            pl.BlockSpec((L, TB, NC), lambda b: (0, b, 0)),  # unpadded per-split logits
            pl.BlockSpec((TB, NC), lambda b: (b, 0)),        # unpadded ensemble
            pl.BlockSpec((1, 2, 128), lambda b: (b, 0, 0)),  # [ce, cot] per-tile partials
        ),
    )

    flops = 2 * B * L * K * NC + 12 * B * L * NC
    transcendentals = B * L * NC + B * NC + B * L
    bytes_accessed = (B * L * K * itemsize + L * K * NC * 4 + B * 4
                      + (L * B + B) * NC * 4 + NB * 2 * 128 * 4)

    logits, ens, loss_part = pl.pallas_call(
        kernel,
        out_shape=(
            jax.ShapeDtypeStruct((L, B, NC), jnp.float32),
            jax.ShapeDtypeStruct((B, NC), jnp.float32),
            jax.ShapeDtypeStruct((NB, 2, 128), jnp.float32),
        ),
        grid_spec=grid_spec,
        compiler_params=pltpu.CompilerParams(
            dimension_semantics=("parallel",),        # batch tiles shard over v7x cores
            vmem_limit_bytes=vmem_limit),
        cost_estimate=pl.CostEstimate(
            flops=int(flops), transcendentals=int(transcendentals),
            bytes_accessed=int(bytes_accessed)),
    )(x_flat, w_exp, b_f32, tgt2d)

    ce_loss = jnp.sum(loss_part[:, 0, 0])
    cot_loss = jnp.sum(loss_part[:, 1, 0])
    return ens, logits, ce_loss, cot_loss


# ---- plain-JAX reference (for correctness) ----------------------------------
def reference(x, target, weights, biases):
    B, C, H, W = x.shape
    L, Cp, NC = weights.shape
    xs = x.reshape(B, L, Cp, H * W).transpose(1, 0, 2, 3).astype(jnp.float32)
    gap = xs.mean(-1)                                                  # [L, B, Cp]
    logits = jnp.einsum('lbc,lcn->lbn', gap, weights.astype(jnp.float32),
                        precision=jax.lax.Precision.HIGHEST) + biases
    logp = jax.nn.log_softmax(logits, -1)
    p = jnp.exp(logp)
    ens = jnp.mean(logits, 0)
    onehot = jax.nn.one_hot(target, NC, dtype=jnp.float32)
    ce = jnp.sum(jnp.mean(-jnp.sum(onehot[None] * logp, -1), -1))
    p_mean = jnp.mean(p, 0)
    H_mean = jnp.mean(jnp.sum(-p_mean * jnp.log(p_mean), -1))
    H_sep = jnp.mean(jnp.sum(-p * logp, -1))
    cot = COT_WEIGHT * (H_mean - H_sep)
    return ens, logits, ce, cot


if __name__ == "__main__":
    key = jax.random.PRNGKey(0)
    kx, kw, kb, kt = jax.random.split(key, 4)

    B, C, H, W = 2, 4, 16, 16
    Cp = C // LOOP_FACTOR

    x = jax.random.normal(kx, (B, C, H, W), dtype=jnp.float32)
    target = jax.random.randint(kt, (B,), 0, NUM_CLASSES)
    weights = 0.1 * jax.random.normal(kw, (LOOP_FACTOR, Cp, NUM_CLASSES), dtype=jnp.float32)
    biases = 0.01 * jax.random.normal(kb, (LOOP_FACTOR, 1, NUM_CLASSES), dtype=jnp.float32)

    ens, outs, ce, cot = splitnet_forward(x, target, weights, biases)
    jax.block_until_ready((ens, outs, ce, cot))

    r_ens, r_outs, r_ce, r_cot = reference(x, target, weights, biases)
    # 1e-4 tolerance: the fused kernel contracts K = Cp*HW on the MXU while the
    # reference pools first, so MXU pass-count / summation-order differences can
    # exceed 1e-5 even though the math is identical.
    assert jnp.allclose(ens, r_ens, rtol=1e-4, atol=1e-4)
    assert jnp.allclose(outs, r_outs, rtol=1e-4, atol=1e-4)
    assert jnp.allclose(ce, r_ce, rtol=1e-4, atol=1e-4)
    assert jnp.allclose(cot, r_cot, rtol=1e-4, atol=1e-4)

    print("KERNEL_OK")
</pallas_src>

<mosaic_0001>
module attributes {stable_mosaic.version = 11 : i64} {
  func.func @_splitnet_kernel(%arg0: i32, %arg1: memref<2x1024xf32, #tpu.memory_space<vmem>>, %arg2: memref<2x512x16xf32, #tpu.memory_space<vmem>>, %arg3: memref<2x1x16xf32, #tpu.memory_space<vmem>>, %arg4: memref<2x1xi32, #tpu.memory_space<vmem>>, %arg5: memref<2x2x16xf32, #tpu.memory_space<vmem>>, %arg6: memref<2x16xf32, #tpu.memory_space<vmem>>, %arg7: memref<1x2x128xf32, #tpu.memory_space<vmem>>) attributes {dimension_semantics = [#tpu.dimension_semantics<parallel>], iteration_bounds = array<i64: 1>, scalar_prefetch = 0 : i64, scratch_operands = 0 : i64, tpu.core_type = #tpu.core_type<tc>, window_params = [{transform_indices = @transform_0, window_bounds = array<i64: 2, 1024>}, {pipeline_mode = #tpu.pipeline_mode<synchronous>, transform_indices = @transform_1, window_bounds = array<i64: 2, 512, 16>}, {pipeline_mode = #tpu.pipeline_mode<synchronous>, transform_indices = @transform_2, window_bounds = array<i64: 2, 1, 16>}, {transform_indices = @transform_3, window_bounds = array<i64: 2, 1>}, {transform_indices = @transform_4, window_bounds = array<i64: 2, 2, 16>}, {transform_indices = @transform_5, window_bounds = array<i64: 2, 16>}, {transform_indices = @transform_6, window_bounds = array<i64: 1, 2, 128>}]} {
    %c0 = arith.constant 0 : index
    %c0_0 = arith.constant 0 : index
    %0 = vector.load %arg4[%c0, %c0_0] : memref<2x1xi32, #tpu.memory_space<vmem>>, vector<2x1xi32>
    %1 = tpu.iota {dimensions = array<i32: 1>} : vector<2x16xi32>
    %cst = arith.constant 0.000000e+00 : f32
    %2 = vector.broadcast %cst : f32 to vector<2x16xf32>
    %cst_1 = arith.constant 0.000000e+00 : f32
    %3 = vector.broadcast %cst_1 : f32 to vector<2x16xf32>
    %c0_2 = arith.constant 0 : index
    %c0_3 = arith.constant 0 : index
    %4 = vector.load %arg1[%c0_2, %c0_3] : memref<2x1024xf32, #tpu.memory_space<vmem>>, vector<2x512xf32>
    %c0_4 = arith.constant 0 : index
    %c0_5 = arith.constant 0 : index
    %c0_6 = arith.constant 0 : index
    %5 = vector.load %arg2[%c0_4, %c0_5, %c0_6] : memref<2x512x16xf32, #tpu.memory_space<vmem>>, vector<1x512x16xf32>
    %6 = vector.shape_cast %5 : vector<1x512x16xf32> to vector<512x16xf32>
    %cst_7 = arith.constant dense<0.000000e+00> : vector<2x16xf32>
    %7 = tpu.matmul %4, %6, %cst_7 {dimension_numbers = #tpu.dot_dimension_numbers<[1], [0], [0], [1], [0, 0, 1, 1], [], []>} : vector<2x512xf32>, vector<512x16xf32>, vector<2x16xf32> -> vector<2x16xf32>
    %c0_8 = arith.constant 0 : index
    %c0_9 = arith.constant 0 : index
    %c0_10 = arith.constant 0 : index
    %8 = vector.load %arg3[%c0_8, %c0_9, %c0_10] : memref<2x1x16xf32, #tpu.memory_space<vmem>>, vector<1x1x16xf32>
    %9 = vector.shape_cast %8 : vector<1x1x16xf32> to vector<1x16xf32>
    %10 = vector.broadcast %9 : vector<1x16xf32> to vector<2x16xf32>
    %11 = arith.addf %7, %10 : vector<2x16xf32>
    %c0_11 = arith.constant 0 : index
    %c0_12 = arith.constant 0 : index
    %c0_13 = arith.constant 0 : index
    %12 = vector.load %arg5[%c0_11, %c0_12, %c0_13] : memref<2x2x16xf32, #tpu.memory_space<vmem>>, vector<1x2x16xf32>
    %13 = vector.shape_cast %12 : vector<1x2x16xf32> to vector<2x16xf32>
    %14 = vector.shape_cast %11 : vector<2x16xf32> to vector<1x2x16xf32>
    tpu.vector_store %arg5[%c0_11, %c0_12, %c0_13], %14 {strides = array<i32>} : memref<2x2x16xf32, #tpu.memory_space<vmem>>, vector<1x2x16xf32>,
    %cst_14 = arith.constant dense<0xFF800000> : vector<2xf32>
    %15 = vector.multi_reduction <maximumf>, %11, %cst_14 [1] : vector<2x16xf32> to vector<2xf32>
    %16 = vector.shape_cast %15 : vector<2xf32> to vector<2x1xf32>
    %17 = vector.broadcast %16 : vector<2x1xf32> to vector<2x16xf32>
    %18 = arith.subf %11, %17 : vector<2x16xf32>
    %19 = math.exp %18 : vector<2x16xf32>
    %cst_15 = arith.constant dense<0.000000e+00> : vector<2xf32>
    %20 = vector.multi_reduction <add>, %19, %cst_15 [1] : vector<2x16xf32> to vector<2xf32>
    %21 = vector.shape_cast %20 : vector<2xf32> to vector<2x1xf32>
    %22 = vector.broadcast %21 : vector<2x1xf32> to vector<2x16xf32>
    %23 = arith.divf %19, %22 : vector<2x16xf32>
    %24 = math.log %21 : vector<2x1xf32>
    %25 = vector.broadcast %24 : vector<2x1xf32> to vector<2x16xf32>
    %26 = arith.subf %18, %25 : vector<2x16xf32>
    %27 = arith.addf %2, %11 : vector<2x16xf32>
    %28 = arith.addf %3, %23 : vector<2x16xf32>
    %29 = vector.broadcast %0 : vector<2x1xi32> to vector<2x16xi32>
    %30 = arith.cmpi eq, %1, %29 : vector<2x16xi32>
    %cst_16 = arith.constant 0.000000e+00 : f32
    %31 = vector.broadcast %cst_16 : f32 to vector<2x16xf32>
    %32 = arith.subf %31, %26 : vector<2x16xf32>
    %cst_17 = arith.constant 0.000000e+00 : f32
    %33 = vector.broadcast %cst_17 : f32 to vector<2x16xf32>
    %34 = arith.select %30, %32, %33 : vector<2x16xi1>, vector<2x16xf32>
    %35 = vector.shape_cast %34 : vector<2x16xf32> to vector<1x2x16xf32>
    %cst_18 = arith.constant dense<0.000000e+00> : vector<1xf32>
    %36 = vector.multi_reduction <add>, %35, %cst_18 [1, 2] : vector<1x2x16xf32> to vector<1xf32>
    %37 = vector.shape_cast %36 : vector<1xf32> to vector<1x1x1xf32>
    %38 = vector.extract %37[0, 0, 0] : f32 from vector<1x1x1xf32>
    %cst_19 = arith.constant 0.000000e+00 : f32
    %39 = arith.addf %cst_19, %38 : f32
    %cst_20 = arith.constant 0.000000e+00 : f32
    %40 = vector.broadcast %cst_20 : f32 to vector<2x16xf32>
    %41 = arith.subf %40, %23 : vector<2x16xf32>
    %42 = arith.mulf %41, %26 : vector<2x16xf32>
    %43 = vector.shape_cast %42 : vector<2x16xf32> to vector<1x2x16xf32>
    %cst_21 = arith.constant dense<0.000000e+00> : vector<1xf32>
    %44 = vector.multi_reduction <add>, %43, %cst_21 [1, 2] : vector<1x2x16xf32> to vector<1xf32>
    %45 = vector.shape_cast %44 : vector<1xf32> to vector<1x1x1xf32>
    %46 = vector.extract %45[0, 0, 0] : f32 from vector<1x1x1xf32>
    %cst_22 = arith.constant 0.000000e+00 : f32
    %47 = arith.addf %cst_22, %46 : f32
    %c0_23 = arith.constant 0 : index
    %c512 = arith.constant 512 : index
    %48 = vector.load %arg1[%c0_23, %c512] : memref<2x1024xf32, #tpu.memory_space<vmem>>, vector<2x512xf32>
    %c1 = arith.constant 1 : index
    %c0_24 = arith.constant 0 : index
    %c0_25 = arith.constant 0 : index
    %49 = vector.load %arg2[%c1, %c0_24, %c0_25] : memref<2x512x16xf32, #tpu.memory_space<vmem>>, vector<1x512x16xf32>
    %50 = vector.shape_cast %49 : vector<1x512x16xf32> to vector<512x16xf32>
    %cst_26 = arith.constant dense<0.000000e+00> : vector<2x16xf32>
    %51 = tpu.matmul %48, %50, %cst_26 {dimension_numbers = #tpu.dot_dimension_numbers<[1], [0], [0], [1], [0, 0, 1, 1], [], []>} : vector<2x512xf32>, vector<512x16xf32>, vector<2x16xf32> -> vector<2x16xf32>
    %c1_27 = arith.constant 1 : index
    %c0_28 = arith.constant 0 : index
    %c0_29 = arith.constant 0 : index
    %52 = vector.load %arg3[%c1_27, %c0_28, %c0_29] : memref<2x1x16xf32, #tpu.memory_space<vmem>>, vector<1x1x16xf32>
    %53 = vector.shape_cast %52 : vector<1x1x16xf32> to vector<1x16xf32>
    %54 = vector.broadcast %53 : vector<1x16xf32> to vector<2x16xf32>
    %55 = arith.addf %51, %54 : vector<2x16xf32>
    %c1_30 = arith.constant 1 : index
    %c0_31 = arith.constant 0 : index
    %c0_32 = arith.constant 0 : index
    %56 = vector.load %arg5[%c1_30, %c0_31, %c0_32] : memref<2x2x16xf32, #tpu.memory_space<vmem>>, vector<1x2x16xf32>
    %57 = vector.shape_cast %56 : vector<1x2x16xf32> to vector<2x16xf32>
    %58 = vector.shape_cast %55 : vector<2x16xf32> to vector<1x2x16xf32>
    tpu.vector_store %arg5[%c1_30, %c0_31, %c0_32], %58 {strides = array<i32>} : memref<2x2x16xf32, #tpu.memory_space<vmem>>, vector<1x2x16xf32>,
    %cst_33 = arith.constant dense<0xFF800000> : vector<2xf32>
    %59 = vector.multi_reduction <maximumf>, %55, %cst_33 [1] : vector<2x16xf32> to vector<2xf32>
    %60 = vector.shape_cast %59 : vector<2xf32> to vector<2x1xf32>
    %61 = vector.broadcast %60 : vector<2x1xf32> to vector<2x16xf32>
    %62 = arith.subf %55, %61 : vector<2x16xf32>
    %63 = math.exp %62 : vector<2x16xf32>
    %cst_34 = arith.constant dense<0.000000e+00> : vector<2xf32>
    %64 = vector.multi_reduction <add>, %63, %cst_34 [1] : vector<2x16xf32> to vector<2xf32>
    %65 = vector.shape_cast %64 : vector<2xf32> to vector<2x1xf32>
    %66 = vector.broadcast %65 : vector<2x1xf32> to vector<2x16xf32>
    %67 = arith.divf %63, %66 : vector<2x16xf32>
    %68 = math.log %65 : vector<2x1xf32>
    %69 = vector.broadcast %68 : vector<2x1xf32> to vector<2x16xf32>
    %70 = arith.subf %62, %69 : vector<2x16xf32>
    %71 = arith.addf %27, %55 : vector<2x16xf32>
    %72 = arith.addf %28, %67 : vector<2x16xf32>
    %73 = vector.broadcast %0 : vector<2x1xi32> to vector<2x16xi32>
    %74 = arith.cmpi eq, %1, %73 : vector<2x16xi32>
    %cst_35 = arith.constant 0.000000e+00 : f32
    %75 = vector.broadcast %cst_35 : f32 to vector<2x16xf32>
    %76 = arith.subf %75, %70 : vector<2x16xf32>
    %cst_36 = arith.constant 0.000000e+00 : f32
    %77 = vector.broadcast %cst_36 : f32 to vector<2x16xf32>
    %78 = arith.select %74, %76, %77 : vector<2x16xi1>, vector<2x16xf32>
    %79 = vector.shape_cast %78 : vector<2x16xf32> to vector<1x2x16xf32>
    %cst_37 = arith.constant dense<0.000000e+00> : vector<1xf32>
    %80 = vector.multi_reduction <add>, %79, %cst_37 [1, 2] : vector<1x2x16xf32> to vector<1xf32>
    %81 = vector.shape_cast %80 : vector<1xf32> to vector<1x1x1xf32>
    %82 = vector.extract %81[0, 0, 0] : f32 from vector<1x1x1xf32>
    %83 = arith.addf %39, %82 : f32
    %cst_38 = arith.constant 0.000000e+00 : f32
    %84 = vector.broadcast %cst_38 : f32 to vector<2x16xf32>
    %85 = arith.subf %84, %67 : vector<2x16xf32>
    %86 = arith.mulf %85, %70 : vector<2x16xf32>
    %87 = vector.shape_cast %86 : vector<2x16xf32> to vector<1x2x16xf32>
    %cst_39 = arith.constant dense<0.000000e+00> : vector<1xf32>
    %88 = vector.multi_reduction <add>, %87, %cst_39 [1, 2] : vector<1x2x16xf32> to vector<1xf32>
    %89 = vector.shape_cast %88 : vector<1xf32> to vector<1x1x1xf32>
    %90 = vector.extract %89[0, 0, 0] : f32 from vector<1x1x1xf32>
    %91 = arith.addf %47, %90 : f32
    %cst_40 = arith.constant 5.000000e-01 : f32
    %92 = vector.broadcast %cst_40 : f32 to vector<2x16xf32>
    %93 = arith.mulf %71, %92 : vector<2x16xf32>
    %c0_41 = arith.constant 0 : index
    %c0_42 = arith.constant 0 : index
    %94 = vector.load %arg6[%c0_41, %c0_42] : memref<2x16xf32, #tpu.memory_space<vmem>>, vector<2x16xf32>
    tpu.vector_store %arg6[%c0_41, %c0_42], %93 {strides = array<i32>} : memref<2x16xf32, #tpu.memory_space<vmem>>, vector<2x16xf32>,
    %cst_43 = arith.constant 5.000000e-01 : f32
    %95 = vector.broadcast %cst_43 : f32 to vector<2x16xf32>
    %96 = arith.mulf %72, %95 : vector<2x16xf32>
    %cst_44 = arith.constant 0.000000e+00 : f32
    %97 = vector.broadcast %cst_44 : f32 to vector<2x16xf32>
    %98 = arith.subf %97, %96 : vector<2x16xf32>
    %99 = math.log %96 : vector<2x16xf32>
    %100 = arith.mulf %98, %99 : vector<2x16xf32>
    %101 = vector.shape_cast %100 : vector<2x16xf32> to vector<1x2x16xf32>
    %cst_45 = arith.constant dense<0.000000e+00> : vector<1xf32>
    %102 = vector.multi_reduction <add>, %101, %cst_45 [1, 2] : vector<1x2x16xf32> to vector<1xf32>
    %103 = vector.shape_cast %102 : vector<1xf32> to vector<1x1x1xf32>
    %104 = vector.extract %103[0, 0, 0] : f32 from vector<1x1x1xf32>
    %cst_46 = arith.constant 5.000000e-01 : f32
    %105 = arith.mulf %83, %cst_46 : f32
    %cst_47 = arith.constant 5.000000e-01 : f32
    %106 = arith.mulf %91, %cst_47 : f32
    %107 = arith.subf %104, %106 : f32
    %cst_48 = arith.constant 5.000000e-01 : f32
    %108 = arith.mulf %cst_48, %107 : f32
    %cst_49 = arith.constant 5.000000e-01 : f32
    %109 = arith.mulf %108, %cst_49 : f32
    %110 = tpu.iota {dimensions = array<i32: 1>} : vector<1x2x128xi32>
    %c0_i32 = arith.constant 0 : i32
    %111 = vector.broadcast %c0_i32 : i32 to vector<1x2x128xi32>
    %112 = arith.cmpi eq, %110, %111 : vector<1x2x128xi32>
    %c1_i32 = arith.constant 1 : i32
    %113 = vector.broadcast %c1_i32 : i32 to vector<1x2x128xi32>
    %114 = arith.cmpi eq, %110, %113 : vector<1x2x128xi32>
    %cst_50 = arith.constant 0.000000e+00 : f32
    %115 = vector.broadcast %109 : f32 to vector<1x2x128xf32>
    %116 = vector.broadcast %cst_50 : f32 to vector<1x2x128xf32>
    %117 = arith.select %114, %115, %116 : vector<1x2x128xi1>, vector<1x2x128xf32>
    %118 = vector.broadcast %105 : f32 to vector<1x2x128xf32>
    %119 = arith.select %112, %118, %117 : vector<1x2x128xi1>, vector<1x2x128xf32>
    %c0_51 = arith.constant 0 : index
    %c0_52 = arith.constant 0 : index
    %c0_53 = arith.constant 0 : index
    %120 = vector.load %arg7[%c0_51, %c0_52, %c0_53] : memref<1x2x128xf32, #tpu.memory_space<vmem>>, vector<1x2x128xf32>
    tpu.vector_store %arg7[%c0_51, %c0_52, %c0_53], %119 {strides = array<i32>} : memref<1x2x128xf32, #tpu.memory_space<vmem>>, vector<1x2x128xf32>,
    return
  }
  func.func @transform_0(%arg0: i32) -> (i32, i32) {
    %c0_i32 = arith.constant 0 : i32
    %c0_i32_0 = arith.constant 0 : i32
    return %arg0, %c0_i32 : i32, i32
  }
  func.func @transform_1(%arg0: i32) -> (i32, i32, i32) {
    %c0_i32 = arith.constant 0 : i32
    %c0_i32_0 = arith.constant 0 : i32
    %c0_i32_1 = arith.constant 0 : i32
    %c0_i32_2 = arith.constant 0 : i32
    return %c0_i32, %c0_i32_0, %c0_i32_1 : i32, i32, i32
  }
  func.func @transform_2(%arg0: i32) -> (i32, i32, i32) {
    %c0_i32 = arith.constant 0 : i32
    %c0_i32_0 = arith.constant 0 : i32
    %c0_i32_1 = arith.constant 0 : i32
    %c0_i32_2 = arith.constant 0 : i32
    return %c0_i32, %c0_i32_0, %c0_i32_1 : i32, i32, i32
  }
  func.func @transform_3(%arg0: i32) -> (i32, i32) {
    %c0_i32 = arith.constant 0 : i32
    %c0_i32_0 = arith.constant 0 : i32
    return %arg0, %c0_i32 : i32, i32
  }
  func.func @transform_4(%arg0: i32) -> (i32, i32, i32) {
    %c0_i32 = arith.constant 0 : i32
    %c0_i32_0 = arith.constant 0 : i32
    %c0_i32_1 = arith.constant 0 : i32
    return %c0_i32, %arg0, %c0_i32_0 : i32, i32, i32
  }
  func.func @transform_5(%arg0: i32) -> (i32, i32) {
    %c0_i32 = arith.constant 0 : i32
    %c0_i32_0 = arith.constant 0 : i32
    return %arg0, %c0_i32 : i32, i32
  }
  func.func @transform_6(%arg0: i32) -> (i32, i32, i32) {
    %c0_i32 = arith.constant 0 : i32
    %c0_i32_0 = arith.constant 0 : i32
    %c0_i32_1 = arith.constant 0 : i32
    return %arg0, %c0_i32, %c0_i32_0 : i32, i32, i32
  }
}

</mosaic_0001>

<bundles_post_ra>
// kernel: splitnet_forward.1
= control target key start
LH: loop header
LB: loop body
LE: loop exit
PB: predicated region body
PF: predicated region fallthrough
CT: control target
= control target key end

     0   :  { %12 = vsyncpa [#allocation3], 0  ;;  %v23_v30 = vlaneseq  ;;  %v936_v31 = vmov 1983009808   ;;  %s1412_s0 = inlined_call_operand.vmem [shape: f32[2,1024], index: 0, kind: input, shape index: {}]   ;;  %s1413_s1 = inlined_call_operand.vmem [shape: f32[2,512,16], index: 1, kind: input, shape index: {}]   ;;  %s1414_s2 = inlined_call_operand.vmem [shape: f32[2,1,16], index: 2, kind: input, shape index: {}]   ;;  %s1415_s3 = inlined_call_operand.vmem [shape: s32[2,1], index: 3, kind: input, shape index: {}]   ;;  %s1416_s4 = inlined_call_operand.hbm [shape: f32[2,2,16], index: 4, kind: output, shape index: {0}]   ;;  %s1417_s5 = inlined_call_operand.hbm [shape: f32[2,16], index: 5, kind: output, shape index: {1}]   ;;  %s1418_s6 = inlined_call_operand.vmem [shape: f32[1,2,128], index: 6, kind: output, shape index: {2}]  }
   0x1   :  { %v57_v0 = vld [vmem:[%s1413_s1 + $0xf8] sm:$0xff]  ;;  %v56_v4 = vld [vmem:[%s1413_s1 + $0xf0] sm:$0xff]  ;;  %v55_v8 = vld [vmem:[%s1413_s1 + $0xe8] sm:$0xff]  ;;  %v100_v32 = vunpack.c.l.s4 %v936_v31 }
   0x2   :  { %v89_v1 = vld [vmem:[%s1413_s1 + $0x1f8] sm:$0xff]  ;;  %719 = vmatprep.subr.mxu0 %v57_v0  ;;  %v88_v5 = vld [vmem:[%s1413_s1 + $0x1f0] sm:$0xff]  ;;  %v87_v9 = vld [vmem:[%s1413_s1 + $0x1e8] sm:$0xff]  ;;  %v1092_v42 = vshrl.u32 %v23_v30, 7 }
   0x3   :  { %v41_v2 = vld [vmem:[%s1413_s1 + $0x78] sm:$0xff]  ;;  %754 = vmatprep.subr.mxu1 %v89_v1  ;;  %v40_v6 = vld [vmem:[%s1413_s1 + $0x70] sm:$0xff]  ;;  %v39_v10 = vld [vmem:[%s1413_s1 + $0x68] sm:$0xff]  ;;  %v101_v41 = vunpack.c.0.s8 %v100_v32 }
   0x4   :  { %v73_v3 = vld [vmem:[%s1413_s1 + $0x178] sm:$0xff]  ;;  %720 = vmatpush3.msra.mxu0 %v41_v2  ;;  %v72_v7 = vld [vmem:[%s1413_s1 + $0x170] sm:$0xff]  ;;  %v71_v11 = vld [vmem:[%s1413_s1 + $0x168] sm:$0xff] }
   0x5   :  { %755 = vmatpush3.msra.mxu1 %v73_v3  ;;  %721 = vmatprep.subr.mxu0 %v56_v4  ;;  %v54_v12 = vld [vmem:[%s1413_s1 + $0xe0] sm:$0xff]  ;;  %v53_v16 = vld [vmem:[%s1413_s1 + $0xd8] sm:$0xff]  ;;  %v52_v20 = vld [vmem:[%s1413_s1 + $0xd0] sm:$0xff]  ;;  %v1119_v51 = vsub.s32 %v101_v41, %v1092_v42 }
   0x6   :  { %756 = vmatprep.subr.mxu1 %v88_v5  ;;  %722 = vmatpush3.msra.mxu0 %v40_v6  ;;  %v86_v13 = vld [vmem:[%s1413_s1 + $0x1e0] sm:$0xff]  ;;  %v85_v17 = vld [vmem:[%s1413_s1 + $0x1d8] sm:$0xff]  ;;  %v84_v21 = vld [vmem:[%s1413_s1 + $0x1d0] sm:$0xff] }
   0x7   :  { %757 = vmatpush3.msra.mxu1 %v72_v7  ;;  %723 = vmatprep.subr.mxu0 %v55_v8  ;;  %v38_v14 = vld [vmem:[%s1413_s1 + $0x60] sm:$0xff]  ;;  %v37_v18 = vld [vmem:[%s1413_s1 + $0x58] sm:$0xff]  ;;  %v36_v22 = vld [vmem:[%s1413_s1 + $0x50] sm:$0xff] }
   0x8   :  { %758 = vmatprep.subr.mxu1 %v87_v9  ;;  %v70_v15 = vld [vmem:[%s1413_s1 + $0x160] sm:$0xff]  ;;  %724 = vmatpush3.msra.mxu0 %v39_v10  ;;  %v69_v19 = vld [vmem:[%s1413_s1 + $0x158] sm:$0xff]  ;;  %v68_v23 = vld [vmem:[%s1413_s1 + $0x150] sm:$0xff] }
   0x9   :  { %759 = vmatpush3.msra.mxu1 %v71_v11  ;;  %725 = vmatprep.subr.mxu0 %v54_v12  ;;  %v51_v24 = vld [vmem:[%s1413_s1 + $0xc8] sm:$0xff]  ;;  %v50_v28 = vld [vmem:[%s1413_s1 + $0xc0] sm:$0xff]  ;;  %v49_v35 = vld [vmem:[%s1413_s1 + $0xb8] sm:$0xff] }
   0xa   :  { %760 = vmatprep.subr.mxu1 %v86_v13  ;;  %726 = vmatpush3.msra.mxu0 %v38_v14  ;;  %v83_v25 = vld [vmem:[%s1413_s1 + $0x1c8] sm:$0xff]  ;;  %v82_v29 = vld [vmem:[%s1413_s1 + $0x1c0] sm:$0xff]  ;;  %v81_v36 = vld [vmem:[%s1413_s1 + $0x1b8] sm:$0xff] }
   0xb   :  { %761 = vmatpush3.msra.mxu1 %v70_v15  ;;  %727 = vmatprep.subr.mxu0 %v53_v16  ;;  %v35_v26 = vld [vmem:[%s1413_s1 + $0x48] sm:$0xff]  ;;  %v34_v33 = vld [vmem:[%s1413_s1 + $0x40] sm:$0xff]  ;;  %v33_v37 = vld [vmem:[%s1413_s1 + $0x38] sm:$0xff] }
   0xc   :  { %762 = vmatprep.subr.mxu1 %v85_v17  ;;  %728 = vmatpush3.msra.mxu0 %v37_v18  ;;  %v67_v27 = vld [vmem:[%s1413_s1 + $0x148] sm:$0xff]  ;;  %v66_v34 = vld [vmem:[%s1413_s1 + $0x140] sm:$0xff]  ;;  %v65_v38 = vld [vmem:[%s1413_s1 + $0x138] sm:$0xff] }
   0xd   :  { %763 = vmatpush3.msra.mxu1 %v69_v19  ;;  %729 = vmatprep.subr.mxu0 %v52_v20  ;;  %v48_v39 = vld [vmem:[%s1413_s1 + $0xb0] sm:$0xff]  ;;  %v47_v45 = vld [vmem:[%s1413_s1 + $0xa8] sm:$0xff]  ;;  %v46_v49 = vld [vmem:[%s1413_s1 + $0xa0] sm:$0xff] }
   0xe   :  { %764 = vmatprep.subr.mxu1 %v84_v21  ;;  %730 = vmatpush3.msra.mxu0 %v36_v22  ;;  %v80_v40 = vld [vmem:[%s1413_s1 + $0x1b0] sm:$0xff]  ;;  %v79_v46 = vld [vmem:[%s1413_s1 + $0x1a8] sm:$0xff]  ;;  %v78_v50 = vld [vmem:[%s1413_s1 + $0x1a0] sm:$0xff] }
   0xf   :  { %765 = vmatpush3.msra.mxu1 %v68_v23  ;;  %731 = vmatprep.subr.mxu0 %v51_v24  ;;  %v32_v43 = vld [vmem:[%s1413_s1 + $0x30] sm:$0xff]  ;;  %v31_v47 = vld [vmem:[%s1413_s1 + $0x28] sm:$0xff]  ;;  %v30_v52 = vld [vmem:[%s1413_s1 + $0x20] sm:$0xff] }
  0x10   :  { %766 = vmatprep.subr.mxu1 %v83_v25  ;;  %732 = vmatpush3.msra.mxu0 %v35_v26  ;;  %v64_v44 = vld [vmem:[%s1413_s1 + $0x130] sm:$0xff]  ;;  %v63_v48 = vld [vmem:[%s1413_s1 + $0x128] sm:$0xff]  ;;  %v62_v53 = vld [vmem:[%s1413_s1 + $0x120] sm:$0xff] }
  0x11   :  { %767 = vmatpush3.msra.mxu1 %v67_v27  ;;  %733 = vmatprep.subr.mxu0 %v50_v28  ;;  %v25_v54 = vld [vmem:[%s1412_s0] sm:$0xff]  ;;  %v45_v55 = vld [vmem:[%s1413_s1 + $0x98] sm:$0xff]  ;;  %v44_v60 = vld [vmem:[%s1413_s1 + $0x90] sm:$0xff] }
  0x12   :  { %768 = vmatprep.subr.mxu1 %v82_v29  ;;  %734 = vmatpush3.msra.mxu0 %v34_v33  ;;  %v77_v56 = vld [vmem:[%s1413_s1 + $0x198] sm:$0xff]  ;;  %v98_v57 = vcombine.high %v25_v54, %v25_v54  ;;  %v76_v61 = vld [vmem:[%s1413_s1 + $0x190] sm:$0xff]  ;;  %v105_v62 = vrot.slane %v25_v54, %v1119_v51  ;;  %v43_v1 = vld [vmem:[%s1413_s1 + $0x88] sm:$0xff] }
  0x13   :  { %769 = vmatpush3.msra.mxu1 %v66_v34  ;;  %735 = vmatprep.subr.mxu0 %v49_v35  ;;  %v29_v58 = vld [vmem:[%s1413_s1 + $0x18] sm:$0xff]  ;;  %v28_v63 = vld [vmem:[%s1413_s1 + $0x10] sm:$0xff]  ;;  %v75_v2 = vld [vmem:[%s1413_s1 + $0x188] sm:$0xff] }
  0x14   :  { %770 = vmatprep.subr.mxu1 %v81_v36  ;;  %736 = vmatpush3.msra.mxu0 %v33_v37  ;;  %v61_v59 = vld [vmem:[%s1413_s1 + $0x118] sm:$0xff]  ;;  %v60_v0 = vld [vmem:[%s1413_s1 + $0x110] sm:$0xff]  ;;  %v112_v3 = vrot.slane %v98_v57, %v1119_v51  ;;  %v27_v4 = vld [vmem:[%s1413_s1 + $0x8] sm:$0xff]  ;;  %v113_v8 = vcombine.high %v105_v62, %v105_v62 }
  0x15   :  { %771 = vmatpush3.msra.mxu1 %v65_v38  ;;  %737 = vmatprep.subr.mxu0 %v48_v39  ;;  %v59_v5 = vld [vmem:[%s1413_s1 + $0x108] sm:$0xff]  ;;  %v42_v6 = vld [vmem:[%s1413_s1 + $0x80] sm:$0xff]  ;;  %v684_v12 = vld [vmem:[%s1413_s1 + $0x2f8] sm:$0xff] }
  0x16   :  { %772 = vmatprep.subr.mxu1 %v80_v40  ;;  %738 = vmatpush3.msra.mxu0 %v32_v43  ;;  %v74_v7 = vld [vmem:[%s1413_s1 + $0x180] sm:$0xff]  ;;  %v114_v11 = vcombine.high %v112_v3, %v112_v3  ;;  %v716_v13 = vld [vmem:[%s1413_s1 + $0x3f8] sm:$0xff]  ;;  %v683_v16 = vld [vmem:[%s1413_s1 + $0x2f0] sm:$0xff] }
  0x17   :  { %773 = vmatpush3.msra.mxu1 %v64_v44  ;;  %739 = vmatprep.subr.mxu0 %v47_v45  ;;  %v26_v9 = vld [vmem:[%s1413_s1] sm:$0xff]  ;;  %v668_v14 = vld [vmem:[%s1413_s1 + $0x278] sm:$0xff]  ;;  %v715_v17 = vld [vmem:[%s1413_s1 + $0x3f0] sm:$0xff] }
  0x18   :  { %774 = vmatprep.subr.mxu1 %v79_v46  ;;  %740 = vmatpush3.msra.mxu0 %v31_v47  ;;  %v58_v10 = vld [vmem:[%s1413_s1 + $0x100] sm:$0xff]  ;;  %v700_v15 = vld [vmem:[%s1413_s1 + $0x378] sm:$0xff]  ;;  %v667_v18 = vld [vmem:[%s1413_s1 + $0x270] sm:$0xff] }
  0x19   :  { %775 = vmatpush3.msra.mxu1 %v63_v48  ;;  %741 = vmatprep.subr.mxu0 %v46_v49  ;;  %v699_v19 = vld [vmem:[%s1413_s1 + $0x370] sm:$0xff]  ;;  %v682_v20 = vld [vmem:[%s1413_s1 + $0x2e8] sm:$0xff]  ;;  %v681_v24 = vld [vmem:[%s1413_s1 + $0x2e0] sm:$0xff] }
  0x1a   :  { %776 = vmatprep.subr.mxu1 %v78_v50  ;;  %742 = vmatpush3.msra.mxu0 %v30_v52  ;;  %v714_v21 = vld [vmem:[%s1413_s1 + $0x3e8] sm:$0xff]  ;;  %v713_v25 = vld [vmem:[%s1413_s1 + $0x3e0] sm:$0xff]  ;;  %v680_v28 = vld [vmem:[%s1413_s1 + $0x2d8] sm:$0xff] }
  0x1b   :  { %777 = vmatpush3.msra.mxu1 %v62_v53  ;;  %743 = vmatprep.subr.mxu0 %v45_v55  ;;  %v666_v22 = vld [vmem:[%s1413_s1 + $0x268] sm:$0xff]  ;;  %v665_v26 = vld [vmem:[%s1413_s1 + $0x260] sm:$0xff]  ;;  %v712_v29 = vld [vmem:[%s1413_s1 + $0x3d8] sm:$0xff] }
  0x1c   :  { %778 = vmatprep.subr.mxu1 %v77_v56  ;;  %744 = vmatpush3.msra.mxu0 %v29_v58  ;;  %v698_v23 = vld [vmem:[%s1413_s1 + $0x368] sm:$0xff]  ;;  %v697_v27 = vld [vmem:[%s1413_s1 + $0x360] sm:$0xff]  ;;  %v664_v31 = vld [vmem:[%s1413_s1 + $0x258] sm:$0xff] }
  0x1d   :  { %779 = vmatpush3.msra.mxu1 %v61_v59  ;;  %745 = vmatprep.subr.mxu0 %v44_v60  ;;  %v696_v32 = vld [vmem:[%s1413_s1 + $0x358] sm:$0xff]  ;;  %v679_v33 = vld [vmem:[%s1413_s1 + $0x2d0] sm:$0xff] }
  0x1e   :  { %780 = vmatprep.subr.mxu1 %v76_v61  ;;  %746 = vmatpush3.msra.mxu0 %v28_v63  ;;  %v711_v34 = vld [vmem:[%s1413_s1 + $0x3d0] sm:$0xff] }
  0x1f   :  { %781 = vmatpush3.msra.mxu1 %v60_v0  ;;  %747 = vmatprep.subr.mxu0 %v43_v1  ;;  %v663_v35 = vld [vmem:[%s1413_s1 + $0x250] sm:$0xff] }
  0x20   :  { %782 = vmatprep.subr.mxu1 %v75_v2  ;;  %748 = vmatpush3.msra.mxu0 %v27_v4  ;;  %v695_v36 = vld [vmem:[%s1413_s1 + $0x350] sm:$0xff] }
  0x21   :  { %783 = vmatpush3.msra.mxu1 %v59_v5  ;;  %749 = vmatprep.subr.mxu0 %v42_v6 }
  0x22   :  { %784 = vmatprep.subr.mxu1 %v74_v7  ;;  %750 = vmatpush3.msra.mxu0 %v26_v9 }
  0x23   :  { %183 = vmatprep.mubr.f32.mxu0 %v113_v8  ;;  %785 = vmatpush3.msra.mxu1 %v58_v10 }
  0x24   :  { %184 = vmatmul.mubr.f32.vlgmr.msra.gmra.mxu0 %v105_v62  ;;  %253 = vmatprep.mubr.f32.mxu1 %v114_v11 }
  0x25   :  { %789 = vmatprep.subr.mxu0 %v684_v12  ;;  %824 = vmatprep.subr.mxu1 %v716_v13 }
  0x26   :  { %254 = vmatmul.mubr.f32.vlgmr.msra.gmra.mxu1 %v112_v3  ;;  %790 = vmatpush3.msra.mxu0 %v668_v14 }
  0x27   :  { %825 = vmatpush3.msra.mxu1 %v700_v15  ;;  %791 = vmatprep.subr.mxu0 %v683_v16 }
  0x28   :  { %826 = vmatprep.subr.mxu1 %v715_v17  ;;  %792 = vmatpush3.msra.mxu0 %v667_v18 }
  0x29   :  { %827 = vmatpush3.msra.mxu1 %v699_v19  ;;  %793 = vmatprep.subr.mxu0 %v682_v20 }
  0x2a   :  { %828 = vmatprep.subr.mxu1 %v714_v21  ;;  %794 = vmatpush3.msra.mxu0 %v666_v22 }
  0x2b   :  { %829 = vmatpush3.msra.mxu1 %v698_v23  ;;  %795 = vmatprep.subr.mxu0 %v681_v24 }
  0x2c   :  { %830 = vmatprep.subr.mxu1 %v713_v25  ;;  %796 = vmatpush3.msra.mxu0 %v665_v26 }
  0x2d   :  { %831 = vmatpush3.msra.mxu1 %v697_v27  ;;  %797 = vmatprep.subr.mxu0 %v680_v28 }
  0x2e   :  { %832 = vmatprep.subr.mxu1 %v712_v29 }
  0x2f   :  { %13 = vsyncpa [#allocation5], 0  ;;  %798 = vmatpush3.msra.mxu0 %v664_v31  ;;  %833 = vmatpush3.msra.mxu1 %v696_v32  ;;  %v678_v37 = vld [vmem:[%s1413_s1 + $0x2c8] sm:$0xff]  ;;  %v677_v41 = vld [vmem:[%s1413_s1 + $0x2c0] sm:$0xff]  ;;  %vm259_vm0 = vcmask 123904  }
  0x30   :  { %v710_v38 = vld [vmem:[%s1413_s1 + $0x3c8] sm:$0xff]  ;;  %799 = vmatprep.subr.mxu0 %v679_v33  ;;  %834 = vmatprep.subr.mxu1 %v711_v34  ;;  %v709_v43 = vld [vmem:[%s1413_s1 + $0x3c0] sm:$0xff]  ;;  %v676_v46 = vld [vmem:[%s1413_s1 + $0x2b8] sm:$0xff] }
  0x31   :  { %v662_v39 = vld [vmem:[%s1413_s1 + $0x248] sm:$0xff]  ;;  %800 = vmatpush3.msra.mxu0 %v663_v35  ;;  %835 = vmatpush3.msra.mxu1 %v695_v36  ;;  %v661_v44 = vld [vmem:[%s1413_s1 + $0x240] sm:$0xff]  ;;  %v708_v47 = vld [vmem:[%s1413_s1 + $0x3b8] sm:$0xff] }
  0x32   :  { %v694_v40 = vld [vmem:[%s1413_s1 + $0x348] sm:$0xff]  ;;  %801 = vmatprep.subr.mxu0 %v678_v37  ;;  %836 = vmatprep.subr.mxu1 %v710_v38  ;;  %v693_v45 = vld [vmem:[%s1413_s1 + $0x340] sm:$0xff]  ;;  %v660_v48 = vld [vmem:[%s1413_s1 + $0x238] sm:$0xff] }
  0x33   :  { %802 = vmatpush3.msra.mxu0 %v662_v39  ;;  %837 = vmatpush3.msra.mxu1 %v694_v40  ;;  %v692_v49 = vld [vmem:[%s1413_s1 + $0x338] sm:$0xff]  ;;  %v675_v50 = vld [vmem:[%s1413_s1 + $0x2b0] sm:$0xff]  ;;  %v674_v55 = vld [vmem:[%s1413_s1 + $0x2a8] sm:$0xff] }
  0x34   :  { %803 = vmatprep.subr.mxu0 %v677_v41  ;;  %838 = vmatprep.subr.mxu1 %v709_v43  ;;  %v707_v52 = vld [vmem:[%s1413_s1 + $0x3b0] sm:$0xff]  ;;  %v706_v56 = vld [vmem:[%s1413_s1 + $0x3a8] sm:$0xff]  ;;  %v673_v60 = vld [vmem:[%s1413_s1 + $0x2a0] sm:$0xff] }
  0x35   :  { %804 = vmatpush3.msra.mxu0 %v661_v44  ;;  %839 = vmatpush3.msra.mxu1 %v693_v45  ;;  %v659_v53 = vld [vmem:[%s1413_s1 + $0x230] sm:$0xff]  ;;  %v307_v57 = vld [vmem:[%s1412_s0 + $0x8] sm:$0xff]  ;;  %v705_v61 = vld [vmem:[%s1413_s1 + $0x3a0] sm:$0xff]  ;;  %v937_v44 = vmov 0  }
  0x36   :  { %805 = vmatprep.subr.mxu0 %v676_v46  ;;  %840 = vmatprep.subr.mxu1 %v708_v47  ;;  %v691_v54 = vld [vmem:[%s1413_s1 + $0x330] sm:$0xff]  ;;  %v658_v58 = vld [vmem:[%s1413_s1 + $0x228] sm:$0xff]  ;;  %v657_v62 = vld [vmem:[%s1413_s1 + $0x220] sm:$0xff]  ;;  %v382_v0 = vcombine.high %v307_v57, %v307_v57  ;;  %v389_v7 = vrot.slane %v307_v57, %v1119_v51 }
  0x37   :  { %806 = vmatpush3.msra.mxu0 %v660_v48  ;;  %841 = vmatpush3.msra.mxu1 %v692_v49  ;;  %v690_v59 = vld [vmem:[%s1413_s1 + $0x328] sm:$0xff]  ;;  %v689_v63 = vld [vmem:[%s1413_s1 + $0x320] sm:$0xff]  ;;  %v672_v1 = vld [vmem:[%s1413_s1 + $0x298] sm:$0xff] }
  0x38   :  { %807 = vmatprep.subr.mxu0 %v675_v50  ;;  %842 = vmatprep.subr.mxu1 %v707_v52  ;;  %v704_v2 = vld [vmem:[%s1413_s1 + $0x398] sm:$0xff]  ;;  %v671_v5 = vld [vmem:[%s1413_s1 + $0x290] sm:$0xff]  ;;  %v396_v10 = vrot.slane %v382_v0, %v1119_v51  ;;  %v670_v11 = vld [vmem:[%s1413_s1 + $0x288] sm:$0xff]  ;;  %v397_v16 = vcombine.high %v389_v7, %v389_v7 }
  0x39   :  { %808 = vmatpush3.msra.mxu0 %v659_v53  ;;  %843 = vmatpush3.msra.mxu1 %v691_v54  ;;  %v656_v3 = vld [vmem:[%s1413_s1 + $0x218] sm:$0xff]  ;;  %v703_v6 = vld [vmem:[%s1413_s1 + $0x390] sm:$0xff]  ;;  %v702_v12 = vld [vmem:[%s1413_s1 + $0x388] sm:$0xff] }
  0x3a   :  { %809 = vmatprep.subr.mxu0 %v674_v55  ;;  %844 = vmatprep.subr.mxu1 %v706_v56  ;;  %v688_v4 = vld [vmem:[%s1413_s1 + $0x318] sm:$0xff]  ;;  %v655_v8 = vld [vmem:[%s1413_s1 + $0x210] sm:$0xff]  ;;  %v654_v13 = vld [vmem:[%s1413_s1 + $0x208] sm:$0xff]  ;;  %v398_v18 = vcombine.high %v396_v10, %v396_v10 }
  0x3b   :  { %810 = vmatpush3.msra.mxu0 %v658_v58  ;;  %845 = vmatpush3.msra.mxu1 %v690_v59  ;;  %v687_v9 = vld [vmem:[%s1413_s1 + $0x310] sm:$0xff]  ;;  %v686_v51 = vld [vmem:[%s1413_s1 + $0x308] sm:$0xff]  ;;  %v669_v14 = vld [vmem:[%s1413_s1 + $0x280] sm:$0xff] }
  0x3c   :  { %811 = vmatprep.subr.mxu0 %v673_v60  ;;  %846 = vmatprep.subr.mxu1 %v705_v61  ;;  %v701_v15 = vld [vmem:[%s1413_s1 + $0x380] sm:$0xff] }
  0x3d   :  { %812 = vmatpush3.msra.mxu0 %v657_v62  ;;  %847 = vmatpush3.msra.mxu1 %v689_v63  ;;  %v653_v17 = vld [vmem:[%s1413_s1 + $0x200] sm:$0xff]  ;;  %v24_v62 = vand.u32 127, %v23_v30 }
  0x3e   :  { %813 = vmatprep.subr.mxu0 %v672_v1  ;;  %848 = vmatprep.subr.mxu1 %v704_v2  ;;  %v685_v19 = vld [vmem:[%s1413_s1 + $0x300] sm:$0xff] }
  0x3f   :  { %814 = vmatpush3.msra.mxu0 %v656_v3  ;;  %849 = vmatpush3.msra.mxu1 %v688_v4  ;;  %v652_v22 = vld [vmem:[%s1414_s2] ss:$0 sm:$0xff]  ;;  %v718_v33 = vld [vmem:[%s1414_s2 + $0x1] ss:$0 sm:$0xff]  ;;  %s938_s2 = smov [#allocation2]  }
  0x40   :  { %815 = vmatprep.subr.mxu0 %v671_v5  ;;  %850 = vmatprep.subr.mxu1 %v703_v6  ;;  %v22_v45 = vld [vmem:[%s1415_s3] sm:$0x3]  ;;  %s623_s3 = sshll.u32 %s938_s2, 4  ;;  %s624_s3 = int_to_ptr.vmem [resolvable:$true] %s623_s3 }
  0x41   :  { %816 = vmatpush3.msra.mxu0 %v655_v8  ;;  %851 = vmatpush3.msra.mxu1 %v687_v9  ;;  %s892_s20 = scalar_lea.vmem %s624_s3, 64  ;;  %p897_p1 = scmp.lt.s32.totalorder %s624_s3, %s624_s3 }
  0x42   :  { %817 = vmatprep.subr.mxu0 %v670_v11  ;;  %852 = vmatprep.subr.mxu1 %v702_v12  ;;  %p893_p0 = scmp.ne.s32.totalorder %s624_s3, %s892_s20  ;;  %p898_p2 = scmp.lt.s32.totalorder %s892_s20, %s892_s20 }
  0x43   :  { %818 = vmatpush3.msra.mxu0 %v654_v13  ;;  %853 = vmatpush3.msra.mxu1 %v686_v51 }
  0x44   :  { %819 = vmatprep.subr.mxu0 %v669_v14  ;;  %854 = vmatprep.subr.mxu1 %v701_v15  ;;  %p899_p3 = por %p898_p2, %p897_p1 }
  0x45   :  { %820 = vmatpush3.msra.mxu0 %v653_v17  ;;  %467 = vmatprep.mubr.f32.mxu0 %v397_v16 }
  0x46   :  { %855 = vmatpush3.msra.mxu1 %v685_v19  ;;  %537 = vmatprep.mubr.f32.mxu1 %v398_v18  ;;  %p900_p4 = pnand %p899_p3, %p893_p0 }
  0x47   :  { %468 = vmatmul.mubr.f32.vlgmr.msra.gmra.mxu0 %v389_v7  ;;  %538 = vmatmul.mubr.f32.vlgmr.msra.gmra.mxu1 %v396_v10 }
  0x48   :  { %875 = vset.pattern.permute.xlu0 %v937_v44 }
  0xe4   :  { %v751_v20 = vpop.f32.mrf.mxu0 }
  0xe6   :  { %v786_v21 = vpop.f32.mrf.mxu1  ;;  %v752_v23 = vpop.f32.mrf.mxu0 }
  0xe7   :  { %v753_v24 = vadd.f32 %v752_v23, %v751_v20 }
  0xe8   :  { %v787_v25 = vpop.f32.mrf.mxu1 }
  0xe9   :  { %v186_v26 = vadd.f32 %v753_v24, %v652_v22  ;;  %v788_v27 = vadd.f32 %v787_v25, %v786_v21 }
  0xeb   :  { %v256_v28 = vadd.f32 %v788_v27, %v186_v26 }
  0xed   :  { %v261_v29 = vsel %vm259_vm0, %v256_v28, -inf  ;;  %260 = vst.msk [vmem:[#allocation2] sm:$0x3] %vm259_vm0, %v256_v28 }
  0xee   :  { %262 = vmax.xlane.f32.xlu0 %v261_v29 }
 0x107   :  { %v821_v31 = vpop.f32.mrf.mxu0  ;;  %v856_v32 = vpop.f32.mrf.mxu1 }
 0x109   :  { %v822_v34 = vpop.f32.mrf.mxu0  ;;  %v857_v35 = vpop.f32.mrf.mxu1 }
 0x10a   :  { %v823_v36 = vadd.f32 %v822_v34, %v821_v31  ;;  %v858_v38 = vadd.f32 %v857_v35, %v856_v32 }
 0x10c   :  { %v470_v37 = vadd.f32 %v823_v36, %v718_v33 }
 0x10e   :  { %v540_v39 = vadd.f32 %v858_v38, %v470_v37 }
 0x110   :  { %544 = vst.msk [vmem:[#allocation2 + $0x2] sm:$0x3] %vm259_vm0, %v540_v39  ;;  %v545_v40 = vsel %vm259_vm0, %v540_v39, -inf  ;;  %v559_v41 = vadd.f32 %v540_v39, %v256_v28 }
 0x111   :  { %546 = vmax.xlane.f32.xlu0 %v545_v40 }
 0x112   :  { %v587_v43 = vmul.f32 0.5, %v559_v41 }
 0x114   :  { %588 = vst.msk [vmem:[#allocation4] sm:$0x3] %vm259_vm0, %v587_v43 }
 0x127   :  { %278 = vperm.xlu0 %875, %v22_v45  }
 0x177   :  { %v263_v46 = vpop.xlane.xlu0 %262 }
 0x178   :  { %v264_v47 = vsub.f32 %v256_v28, %v263_v46 }
 0x17a   :  { %v265_v48 = vmul.f32 1.442695, %v264_v47 }
 0x17c   :  { %878 = vpow2.f32 %v265_v48 }
 0x189   :  { %v879_v49 = vpop.eup %878 }
 0x18a   :  { %v267_v50 = vsel %vm259_vm0, %v879_v49, 0.0 }
 0x18b   :  { %268 = vadd.xlane.f32.xlu1 %v267_v50 }
 0x19a   :  { %v547_v52 = vpop.xlane.xlu0 %546 }
 0x19b   :  { %v548_v53 = vsub.f32 %v540_v39, %v547_v52 }
 0x19d   :  { %v549_v54 = vmul.f32 1.442695, %v548_v53 }
 0x19f   :  { %880 = vpow2.f32 %v549_v54 }
 0x1a2   :  { %v279_v63 = vpop.permute.xlu0 %278 }
 0x1a3   :  { %vm280_vm1 = vcmp.eq.s32.totalorder %v24_v62, %v279_v63 }
 0x1ac   :  { %v881_v55 = vpop.eup %880 }
 0x1ad   :  { %v551_v56 = vsel %vm259_vm0, %v881_v55, 0.0 }
 0x1ae   :  { %552 = vadd.xlane.f32.xlu1 %v551_v56 }
 0x214   :  { %v269_v57 = vpop.xlane.xlu1 %268 }
 0x215   :  { %882 = vrcp.f32 %v269_v57 }
 0x216   :  { %884 = vlog2.f32 %v269_v57 }
 0x222   :  { %v883_v58 = vpop.eup %882 }
 0x223   :  { %v885_v59 = vpop.eup %884  ;;  %v271_v60 = vmul.f32 %v883_v58, %v879_v49 }
 0x224   :  { %v273_v61 = vmul.f32 0.6931472, %v885_v59 }
 0x225   :  { %v294_v0 = vsub.f32 0.0, %v271_v60 }
 0x226   :  { %v274_v1 = vsub.f32 %v264_v47, %v273_v61 }
 0x228   :  { %v295_v2 = vmul.f32 %v294_v0, %v274_v1  ;;  %v281_v3 = vsub.f32 0.0, %v274_v1 }
 0x22a   :  { %v296_v4 = vsel %vm259_vm0, %v295_v2, 0.0  ;;  %v282_v5 = vsel %vm280_vm1, %v281_v3, 0.0 }
 0x22b   :  { %297 = vadd.xlane.f32.xlu1 %v296_v4  ;;  %v283_v6 = vsel %vm259_vm0, %v282_v5, 0.0 }
 0x22f   :  { %284 = vadd.xlane.f32.xlu1 %v283_v6 }
 0x237   :  { %v553_v7 = vpop.xlane.xlu1 %552 }
 0x238   :  { %886 = vrcp.f32 %v553_v7 }
 0x239   :  { %888 = vlog2.f32 %v553_v7 }
 0x245   :  { %v887_v8 = vpop.eup %886 }
 0x246   :  { %v889_v9 = vpop.eup %888  ;;  %v555_v30 = vmul.f32 %v887_v8, %v881_v55 }
 0x247   :  { %v557_v10 = vmul.f32 0.6931472, %v889_v9 }
 0x248   :  { %v574_v11 = vsub.f32 0.0, %v555_v30  ;;  %v560_v12 = vadd.f32 %v555_v30, %v271_v60 }
 0x249   :  { %v558_v13 = vsub.f32 %v548_v53, %v557_v10 }
 0x24a   :  { %v589_v51 = vmul.f32 0.5, %v560_v12 }
 0x24b   :  { %v575_v14 = vmul.f32 %v574_v11, %v558_v13  ;;  %v561_v15 = vsub.f32 0.0, %v558_v13 }
 0x24c   :  { %890 = vlog2.f32 %v589_v51  ;;  %v590_v20 = vsub.f32 0.0, %v589_v51 }
 0x24d   :  { %v576_v16 = vsel %vm259_vm0, %v575_v14, 0.0  ;;  %v562_v17 = vsel %vm280_vm1, %v561_v15, 0.0 }
 0x24e   :  { %577 = vadd.xlane.f32.xlu1 %v576_v16  ;;  %v563_v18 = vsel %vm259_vm0, %v562_v17, 0.0 }
 0x252   :  { %564 = vadd.xlane.f32.xlu1 %v563_v18 }
 0x259   :  { %v891_v19 = vpop.eup %890 }
 0x25a   :  { %v592_v21 = vmul.f32 0.6931472, %v891_v19 }
 0x25c   :  { %v593_v22 = vmul.f32 %v592_v21, %v590_v20 }
 0x25e   :  { %v594_v23 = vsel %vm259_vm0, %v593_v22, 0.0 }
 0x25f   :  { %595 = vadd.xlane.f32.xlu1 %v594_v23 }
 0x260   :  { %903 = shalt.err (!%p900_p4)
}
 0x261   :  { %s939_s21 = smov 32   ;;  %s940_s22 = smov 2  }
 0x262   :  { %629 = dma.vmem_to_hbm [thread:$0]  %s624_s3, 64, %s1416_s4, [#allocation3], %s939_s21, %s939_s21, %s940_s22  }
 0x263   :  { %s941_s25 = smov [#allocation4]  }
 0x264   :  { %s636_s26 = sshll.u32 %s941_s25, 4  ;;  %s637_s26 = int_to_ptr.vmem [resolvable:$true] %s636_s26 }
 0x265   :  { %s912_s27 = scalar_lea.vmem %s637_s26, 32  ;;  %p917_p6 = scmp.lt.s32.totalorder %s637_s26, %s637_s26 }
 0x266   :  { %p913_p5 = scmp.ne.s32.totalorder %s637_s26, %s912_s27  ;;  %p918_p7 = scmp.lt.s32.totalorder %s912_s27, %s912_s27 }
 0x268   :  { %p919_p8 = por %p918_p7, %p917_p6 }
 0x26a   :  { %p920_p9 = pnand %p919_p8, %p913_p5 }
 0x2b4   :  { %v298_v24 = vpop.xlane.xlu1 %297 }
 0x2b5   :  { %v299_v25 = vrot.slane %v298_v24, 4 }
 0x2b6   :  { %923 = shalt.err (!%p920_p9)
}
 0x2b7   :  { %639 = dma.vmem_to_hbm [thread:$0]  %s637_s26, 32, %s1417_s5, [#allocation5]   ;;  %v300_v26 = vadd.f32 %v299_v25, %v298_v24  ;;  %vm612_vm2 = vcmp.eq.s32.totalorder %v1092_v42, 1  ;;  %vm611_vm3 = vcmp.eq.s32.totalorder %v1092_v42, 0 }
 0x2b8   :  { %v285_v27 = vpop.xlane.xlu1 %284 }
 0x2b9   :  { %v301_v28 = vrot.slane %v300_v26, 2  ;;  %v286_v29 = vrot.slane %v285_v27, 4 }
 0x2bb   :  { %v287_v31 = vadd.f32 %v286_v29, %v285_v27  ;;  %v302_v32 = vadd.f32 %v301_v28, %v300_v26 }
 0x2bd   :  { %v288_v33 = vrot.slane %v287_v31, 2  ;;  %v303_v35 = vrot.slane %v302_v32, 1 }
 0x2bf   :  { %v289_v34 = vadd.f32 %v288_v33, %v287_v31  ;;  %v304_v38 = vadd.f32 %v303_v35, %v302_v32 }
 0x2c1   :  { %v290_v36 = vrot.slane %v289_v34, 1 }
 0x2c3   :  { %v291_v37 = vadd.f32 %v290_v36, %v289_v34 }
 0x2c5   :  { %859 = vpush %v291_v37 }
 0x2c6   :  { %861 = vpush %v304_v38 }
 0x2d7   :  { %v578_v39 = vpop.xlane.xlu1 %577 }
 0x2d8   :  { %v579_v40 = vrot.slane %v578_v39, 4 }
 0x2da   :  { %v580_v41 = vadd.f32 %v579_v40, %v578_v39 }
 0x2db   :  { %v565_v43 = vpop.xlane.xlu1 %564 }
 0x2dc   :  { %v581_v44 = vrot.slane %v580_v41, 2  ;;  %v566_v45 = vrot.slane %v565_v43, 4 }
 0x2de   :  { %v567_v46 = vadd.f32 %v566_v45, %v565_v43  ;;  %v582_v47 = vadd.f32 %v581_v44, %v580_v41 }
 0x2e0   :  { %v568_v48 = vrot.slane %v567_v46, 2  ;;  %v583_v50 = vrot.slane %v582_v47, 1 }
 0x2e2   :  { %v569_v49 = vadd.f32 %v568_v48, %v567_v46  ;;  %v584_v54 = vadd.f32 %v583_v50, %v582_v47 }
 0x2e4   :  { %v570_v52 = vrot.slane %v569_v49, 1 }
 0x2e6   :  { %v571_v53 = vadd.f32 %v570_v52, %v569_v49 }
 0x2e8   :  { %863 = vpush %v571_v53  ;;  %v596_v55 = vpop.xlane.xlu1 %595 }
 0x2e9   :  { %865 = vpush %v584_v54  ;;  %v597_v56 = vrot.slane %v596_v55, 4 }
 0x2eb   :  { %v598_v57 = vadd.f32 %v597_v56, %v596_v55 }
 0x2ed   :  { %v599_v58 = vrot.slane %v598_v57, 2 }
 0x2ef   :  { %v600_v59 = vadd.f32 %v599_v58, %v598_v57 }
 0x2f1   :  { %v601_v60 = vrot.slane %v600_v59, 1 }
 0x2f3   :  { %v602_v61 = vadd.f32 %v601_v60, %v600_v59 }
 0x2f5   :  { %867 = vpush %v602_v61 }
 0x2f6   :  { %s860_s4 = spop %859 }
 0x2f7   :  { %s862_s5 = spop %861 }
 0x319   :  { %s864_s29 = spop %863 }
 0x31a   :  { %s866_s30 = spop %865  ;;  %s573_s9 = sadd.f32 %s864_s29, %s860_s4 }
 0x31b   :  { %s586_s7 = sadd.f32 %s866_s30, %s862_s5 }
 0x31c   :  { %s604_s13 = smul.f32 0.5, %s573_s9 }
 0x31d   :  { %s605_s8 = smul.f32 0.5, %s586_s7 }
 0x31e   :  { %v615_v63 = vstv %s604_s13 }
 0x326   :  { %s868_s10 = spop %867 }
 0x327   :  { %s606_s11 = ssub.f32 %s868_s10, %s605_s8 }
 0x329   :  { %s607_s12 = smul.f32 0.5, %s606_s11 }
 0x32b   :  { %s608_s14 = smul.f32 0.5, %s607_s12 }
 0x32d   :  { %v613_v62 = vstv %s608_s14 }
 0x32e   :  { %v614_v0 = vsel %vm612_vm2, %v613_v62, 0.0 }
 0x32f   :  { %v616_v1 = vsel %vm611_vm3, %v615_v63, %v614_v0 }
 0x330   :  { %617 = vst [vmem:[%s1418_s6] sm:$0x3] %v616_v1 }
 0x331   :  { %932 = dma.done.wait [#allocation3], 64  }
 0x332   :  { %933 = vsyncadd [#allocation3], 4294967232 }
 0x333   :  { %934 = dma.done.wait [#allocation5], 32  }
 0x334   :  { %935 = vsyncadd [#allocation5], 4294967264 }
 0x335   :  { %650 = vsyncpa [#allocation3], 1 }
 0x336   :  { %651 = vsyncpa [#allocation5], 1 }

</bundles_post_ra>
